<compile_context>
chip_gen: v7x
topology: tpu7x:2x2x1
jax: 0.10.0
libtpu: 0.0.40
codegen_flags: <defaults>
</compile_context>

<pallas_src>
import jax
import jax.numpy as jnp
from jax.experimental import pallas as pl
from jax.experimental.pallas import tpu as pltpu

EPS = 1e-6  # matches the +1e-06 inside the PyTorch forward


# ---------------------------------------------------------------------------
# Pallas kernels: fused squared-diff, channel reduction, sqrt (, mask multiply)
# ---------------------------------------------------------------------------
def _epe_masked_kernel(flow_ref, gt_ref, mask_ref, o_ref):
    # flow/gt: (1, C, TS, L) f32; mask/o: (1, 1, TS, L) f32 — all VMEM tiles.
    d = flow_ref[...] - gt_ref[...]                      # VPU elementwise
    s = jnp.sum(d * d, axis=1, keepdims=True)            # C is a major axis -> vreg adds
    o_ref[...] = jnp.sqrt(s + jnp.float32(EPS)) * mask_ref[...]


def _epe_plain_kernel(flow_ref, gt_ref, o_ref):
    d = flow_ref[...] - gt_ref[...]
    s = jnp.sum(d * d, axis=1, keepdims=True)
    o_ref[...] = jnp.sqrt(s + jnp.float32(EPS))


# ---------------------------------------------------------------------------
# Tiling helpers
# ---------------------------------------------------------------------------
def _pick_sublane_tile(s, c, budget_bytes=4 << 20):
    """Largest multiple-of-8 sublane tile that divides S and keeps the
    double-buffered blocks (flow + gt + mask + out) within `budget_bytes`."""
    if s % 8 != 0:
        return s                                  # full-extent block is always legal
    per_row = (2 * c + 2) * 128 * 4 * 2           # bytes per sublane row, x2 buffers
    cap = max(8, (budget_bytes // per_row) // 8 * 8)
    t = min(s, cap)
    while s % t != 0:                             # terminates at t=8 (divides s)
        t -= 8
    return t


def _broadcastable(src_shape, dst_shape):
    if len(src_shape) > len(dst_shape):
        return False
    for s, d in zip(src_shape[::-1], dst_shape[::-1]):
        if s != 1 and s != d:
            return False
    return True


# ---------------------------------------------------------------------------
# Wrapper
# ---------------------------------------------------------------------------
def epe(flow, gt, loss_mask):
    """EPE.forward. flow/gt: (B, C, H, W); loss_mask broadcastable to (B,1,H,W).
    Returns (B, 1, H, W) float32 (promoted shape for exotic masks)."""
    B, C, H, W = flow.shape
    HW = H * W

    gt = jax.lax.stop_gradient(gt)                # mirrors gt.detach()
    flow_f = jnp.asarray(flow, jnp.float32)
    gt_f = jnp.asarray(gt, jnp.float32)

    # Lane-dense spatial factorisation: HW -> (S, L) with L = 128 when possible.
    if HW % 128 == 0:
        L, S = 128, HW // 128
    else:
        L, S = HW, 1                              # full-extent lane block (legal)

    flow4 = flow_f.reshape(B, C, S, L)
    gt4 = gt_f.reshape(B, C, S, L)

    mask = jnp.asarray(loss_mask, jnp.float32)
    fuse_mask = _broadcastable(mask.shape, (B, 1, H, W))

    TS = _pick_sublane_tile(S, C)
    grid = (B, S // TS)
    flow_spec = pl.BlockSpec((1, C, TS, L), lambda b, t: (b, 0, t, 0))
    map_spec = pl.BlockSpec((1, 1, TS, L), lambda b, t: (b, 0, t, 0))
    cparams = pltpu.CompilerParams(dimension_semantics=("parallel", "parallel"))
    out_shape = jax.ShapeDtypeStruct((B, 1, S, L), jnp.float32)

    if fuse_mask:
        mask4 = jnp.broadcast_to(mask, (B, 1, H, W)).reshape(B, 1, S, L)
        out = pl.pallas_call(
            _epe_masked_kernel,
            out_shape=out_shape,
            grid=grid,
            in_specs=[flow_spec, flow_spec, map_spec],
            out_specs=map_spec,
            compiler_params=cparams,
        )(flow4, gt4, mask4)
        return out.reshape(B, 1, H, W)

    # TODO(synk): masks not broadcastable to (B,1,H,W) (e.g. extra channels)
    # change the broadcasted result shape; compute the fused EPE map in-kernel
    # and apply the mask with plain-JAX broadcasting outside.
    out = pl.pallas_call(
        _epe_plain_kernel,
        out_shape=out_shape,
        grid=grid,
        in_specs=[flow_spec, flow_spec],
        out_specs=map_spec,
        compiler_params=cparams,
    )(flow4, gt4)
    return out.reshape(B, 1, H, W) * mask


# ---------------------------------------------------------------------------
# Pure-JAX reference (mirrors the PyTorch forward) for a quick sanity check
# ---------------------------------------------------------------------------
def _epe_ref(flow, gt, loss_mask):
    loss_map = (flow.astype(jnp.float32) - gt.astype(jnp.float32)) ** 2
    loss_map = (loss_map.sum(axis=1, keepdims=True) + EPS) ** 0.5
    return loss_map * loss_mask.astype(jnp.float32)


if __name__ == "__main__":
    key = jax.random.PRNGKey(0)
    k1, k2, k3 = jax.random.split(key, 3)
    B, C, H, W = 2, 2, 16, 16                     # optical flow: 2 channels
    flow = jax.random.normal(k1, (B, C, H, W), dtype=jnp.float32)
    gt = jax.random.normal(k2, (B, C, H, W), dtype=jnp.float32)
    loss_mask = (jax.random.uniform(k3, (B, 1, H, W)) > 0.5).astype(jnp.float32)

    out = jax.jit(epe)(flow, gt, loss_mask)
    jax.block_until_ready(out)

    ref = _epe_ref(flow, gt, loss_mask)
    assert out.shape == (B, 1, H, W), out.shape
    assert jnp.all(jnp.isfinite(out)), "non-finite output"
    assert jnp.allclose(out, ref, atol=1e-5, rtol=1e-5), "mismatch vs reference"
    print("KERNEL_OK")
</pallas_src>

<mosaic_0001>
module attributes {stable_mosaic.version = 11 : i64} {
  func.func @_epe_masked_kernel(%arg0: i32, %arg1: i32, %arg2: memref<1x2x2x128xf32, #tpu.memory_space<vmem>>, %arg3: memref<1x2x2x128xf32, #tpu.memory_space<vmem>>, %arg4: memref<1x1x2x128xf32, #tpu.memory_space<vmem>>, %arg5: memref<1x1x2x128xf32, #tpu.memory_space<vmem>>) attributes {dimension_semantics = [#tpu.dimension_semantics<parallel>, #tpu.dimension_semantics<parallel>], iteration_bounds = array<i64: 2, 1>, scalar_prefetch = 0 : i64, scratch_operands = 0 : i64, tpu.core_type = #tpu.core_type<tc>, window_params = [{transform_indices = @transform_0, window_bounds = array<i64: 1, 2, 2, 128>}, {transform_indices = @transform_1, window_bounds = array<i64: 1, 2, 2, 128>}, {transform_indices = @transform_2, window_bounds = array<i64: 1, 1, 2, 128>}, {transform_indices = @transform_3, window_bounds = array<i64: 1, 1, 2, 128>}]} {
    %c0 = arith.constant 0 : index
    %c0_0 = arith.constant 0 : index
    %c0_1 = arith.constant 0 : index
    %c0_2 = arith.constant 0 : index
    %0 = vector.load %arg2[%c0, %c0_0, %c0_1, %c0_2] : memref<1x2x2x128xf32, #tpu.memory_space<vmem>>, vector<1x2x2x128xf32>
    %c0_3 = arith.constant 0 : index
    %c0_4 = arith.constant 0 : index
    %c0_5 = arith.constant 0 : index
    %c0_6 = arith.constant 0 : index
    %1 = vector.load %arg3[%c0_3, %c0_4, %c0_5, %c0_6] : memref<1x2x2x128xf32, #tpu.memory_space<vmem>>, vector<1x2x2x128xf32>
    %2 = arith.subf %0, %1 : vector<1x2x2x128xf32>
    %3 = arith.mulf %2, %2 : vector<1x2x2x128xf32>
    %cst = arith.constant dense<0.000000e+00> : vector<1x2x128xf32>
    %4 = vector.multi_reduction <add>, %3, %cst [1] : vector<1x2x2x128xf32> to vector<1x2x128xf32>
    %5 = vector.shape_cast %4 : vector<1x2x128xf32> to vector<1x1x2x128xf32>
    %cst_7 = arith.constant 9.99999997E-7 : f32
    %6 = vector.broadcast %cst_7 : f32 to vector<1x1x2x128xf32>
    %7 = arith.addf %5, %6 : vector<1x1x2x128xf32>
    %8 = math.sqrt %7 : vector<1x1x2x128xf32>
    %c0_8 = arith.constant 0 : index
    %c0_9 = arith.constant 0 : index
    %c0_10 = arith.constant 0 : index
    %c0_11 = arith.constant 0 : index
    %9 = vector.load %arg4[%c0_8, %c0_9, %c0_10, %c0_11] : memref<1x1x2x128xf32, #tpu.memory_space<vmem>>, vector<1x1x2x128xf32>
    %10 = arith.mulf %8, %9 : vector<1x1x2x128xf32>
    %c0_12 = arith.constant 0 : index
    %c0_13 = arith.constant 0 : index
    %c0_14 = arith.constant 0 : index
    %c0_15 = arith.constant 0 : index
    %11 = vector.load %arg5[%c0_12, %c0_13, %c0_14, %c0_15] : memref<1x1x2x128xf32, #tpu.memory_space<vmem>>, vector<1x1x2x128xf32>
    tpu.vector_store %arg5[%c0_12, %c0_13, %c0_14, %c0_15], %10 {strides = array<i32>} : memref<1x1x2x128xf32, #tpu.memory_space<vmem>>, vector<1x1x2x128xf32>,
    return
  }
  func.func @transform_0(%arg0: i32, %arg1: i32) -> (i32, i32, i32, i32) {
    %c0_i32 = arith.constant 0 : i32
    %c0_i32_0 = arith.constant 0 : i32
    %c0_i32_1 = arith.constant 0 : i32
    return %arg0, %c0_i32, %arg1, %c0_i32_0 : i32, i32, i32, i32
  }
  func.func @transform_1(%arg0: i32, %arg1: i32) -> (i32, i32, i32, i32) {
    %c0_i32 = arith.constant 0 : i32
    %c0_i32_0 = arith.constant 0 : i32
    %c0_i32_1 = arith.constant 0 : i32
    return %arg0, %c0_i32, %arg1, %c0_i32_0 : i32, i32, i32, i32
  }
  func.func @transform_2(%arg0: i32, %arg1: i32) -> (i32, i32, i32, i32) {
    %c0_i32 = arith.constant 0 : i32
    %c0_i32_0 = arith.constant 0 : i32
    %c0_i32_1 = arith.constant 0 : i32
    return %arg0, %c0_i32, %arg1, %c0_i32_0 : i32, i32, i32, i32
  }
  func.func @transform_3(%arg0: i32, %arg1: i32) -> (i32, i32, i32, i32) {
    %c0_i32 = arith.constant 0 : i32
    %c0_i32_0 = arith.constant 0 : i32
    %c0_i32_1 = arith.constant 0 : i32
    return %arg0, %c0_i32, %arg1, %c0_i32_0 : i32, i32, i32, i32
  }
}

</mosaic_0001>

<bundles_post_ra>
// kernel: epe.1
= control target key start
LH: loop header
LB: loop body
LE: loop exit
PB: predicated region body
PF: predicated region fallthrough
CT: control target
= control target key end

     0   :  { %s477_s12 = smov 0   ;;  %s479_s13 = smov 0   ;;  %s516_s0 = inlined_call_operand.vmem [shape: f32[2,2,2,128], index: 0, kind: input, shape index: {}]   ;;  %s517_s1 = inlined_call_operand.vmem [shape: f32[2,2,2,128], index: 1, kind: input, shape index: {}]   ;;  %s518_s2 = inlined_call_operand.vmem [shape: f32[2,1,2,128], index: 2, kind: input, shape index: {}]   ;;  %s519_s3 = inlined_call_operand.vmem [shape: f32[2,1,2,128], index: 3, kind: output, shape index: {}]  }
   0x1   :  { %s481_s14 = smov 0  }
   0x2 LB: > { %s25_s15 = sadd.s32 1, %s451_s13  ;;  %p396_p0 = scmp.ge.s32.totalorder %s455_s14, 1  ;;  %s455_s14 = sphi %s481_s14, %s13_s14   ;;  %s451_s13 = sphi %s479_s13, %s521_s13   ;;  %s447_s12 = sphi %s477_s12, %s520_s12  }
   0x3   : > { %p27_p1 = scmp.ge.s32.totalorder %s25_s15, 2  ;;  %p185_p2 = scmp.lt.s32.totalorder %s455_s14, 3 }
   0x5   : > { %s523_s15 = smov (%p27_p1, %s25_s15), 0  ;;  %p186_p3 = pnand %p396_p0, %p185_p2 }
   0x6   : > { %p229_p4 = scmp.lt.s32.totalorder (!%p186_p3), %s447_s12, 1  ;;  %vm267_vm0 = vcmask (!%p186_p3), 1041408  }
   0x7   : > { %189 = sbr.rel (%p186_p3) target bundleno = 46 (0x2e), region = 32 }
   0xe   : > { %s525_s12 = smov (!%p229_p4, %s447_s12), 1 }
   0xf   : > { %s405_s16 = sshll.u32 %s525_s12, 2  ;;  %s401_s23 = sshll.u32 %s525_s12, 1 }
  0x10   : > { %s236_s19 = scalar_lea.vmem %s516_s0, %s405_s16  ;;  %s244_s22 = scalar_lea.vmem %s517_s1, %s405_s16 }
  0x11   : > { %v259_v0 = vld [vmem:[%s236_s19] sm:$0x3]  ;;  %v260_v1 = vld [vmem:[%s236_s19 + $0x2] sm:$0x3]  ;;  %s251_s26 = scalar_lea.vmem %s518_s2, %s401_s23  ;;  %s258_s29 = scalar_lea.vmem %s519_s3, %s401_s23 }
  0x12   : > { %v261_v2 = vld [vmem:[%s244_s22] sm:$0x3]  ;;  %v262_v3 = vld [vmem:[%s244_s22 + $0x2] sm:$0x3] }
  0x13   : > { %v263_v4 = vsub.f32 %v259_v0, %v261_v2  ;;  %v264_v5 = vsub.f32 %v260_v1, %v262_v3  ;;  %v279_v15 = vld [vmem:[%s251_s26] sm:$0x3] }
  0x15   : > { %v265_v6 = vmul.f32 %v263_v4, %v263_v4  ;;  %v266_v7 = vmul.f32 %v264_v5, %v264_v5 }
  0x17   : > { %v268_v8 = vsel %vm267_vm0, %v265_v6, 0.0  ;;  %v269_v9 = vsel %vm267_vm0, %v266_v7, 0.0 }
  0x18   : > { %v270_v10 = vadd.f32 %v269_v9, %v268_v8 }
  0x1a   : > { %v271_v11 = vadd.f32 1e-06, %v270_v10 }
  0x1c   : > { %431 = vrsqrt.f32 %v271_v11  ;;  %vm274_vm1 = vcmp.eq.f32.partialorder %v271_v11, inf  ;;  %v277_v13 = vand.u32 2147483648, %v271_v11  ;;  %vm276_vm2 = vcmp.eq.f32.partialorder %v271_v11, 0.0 }
  0x26   : > { %v432_v12 = vpop.eup %431 }
  0x27   : > { %v273_v14 = vmul.f32 %v432_v12, %v271_v11 }
  0x29   : > { %v275_v16 = vsel %vm274_vm1, %v271_v11, %v273_v14 }
  0x2a   : > { %v278_v17 = vsel %vm276_vm2, %v277_v13, %v275_v16 }
  0x2b   : > { %v280_v18 = vmul.f32 %v279_v15, %v278_v17 }
  0x2d   : > { %281 = vst [vmem:[%s258_s29] sm:$0x3] %v280_v18 }
  0x2e PF: > { %s13_s14 = sadd.s32 1, %s455_s14   ;;  %s520_s12 = smov %s451_s13 }
  0x2f   : > { %p10_p5 = scmp.ge.s32.totalorder %s13_s14, 4   ;;  %s521_s13 = smov %s523_s15 }
  0x31   :  { %12 = sbr.rel (!%p10_p5) target bundleno = 2 (0x2), region = 68 }

</bundles_post_ra>
